<compile_context>
chip_gen: v6e
topology: v6e:2x2x1
jax: 0.10.0
libtpu: 0.0.40
codegen_flags: <defaults>
</compile_context>

<pallas_src>
import functools

import jax
import jax.numpy as jnp
from jax.experimental import pallas as pl
from jax.experimental.pallas import tpu as pltpu

DIMS = (110, 132, 192, 216, 251)
LANE = 128
MAX_TILE_B = 1024  # per-step rows cap: tiny VMEM footprint on every generation


def _round_up(n, m):
    return ((n + m - 1) // m) * m


PADDED = tuple(_round_up(d, LANE) for d in DIMS)  # (128, 256, 256, 256, 256)


@functools.lru_cache(maxsize=1)
def _bf16_elementwise_ok():
    """bf16 bias/ReLU only where the VPU has native bf16 ALUs (v6e / v7x)."""
    try:
        kind = jax.devices()[0].device_kind.lower()
    except Exception:
        return False
    return ("v6" in kind) or ("v7" in kind)


def make_dqn_kernel(bf16_elementwise):
    act_dtype = jnp.bfloat16 if bf16_elementwise else jnp.float32

    def dqn_kernel(x_ref,
                   w1_ref, b1_ref,
                   w2_ref, b2_ref,
                   w3_ref, b3_ref,
                   w4_ref, b4_ref,
                   out_ref):
        # Fully fused forward pass: activations never leave VMEM between layers.
        h = x_ref[...]  # bf16, pre-cast/padded outside the kernel
        for w_ref, b_ref in ((w1_ref, b1_ref), (w2_ref, b2_ref), (w3_ref, b3_ref)):
            y = jnp.dot(h, w_ref[...], preferred_element_type=jnp.float32)
            y = y.astype(act_dtype) + b_ref[...]     # bias-add in act_dtype
            y = jnp.maximum(y, 0.0)                  # ReLU in act_dtype
            h = y.astype(jnp.bfloat16)               # MXU operand for next layer
        # Final (head) layer in f32: f32 weights + f32 matmul + f32 bias.
        out = jnp.dot(h.astype(jnp.float32), w4_ref[...],
                      preferred_element_type=jnp.float32) + b4_ref[...]
        out_ref[...] = out.astype(out_ref.dtype)

    return dqn_kernel


def _choose_batch_tiling(B):
    """Pick (tile_b, b_pad, grid) per the review's overhead/megacore guidance."""
    if B <= 128:
        # Single step; multiple of 16 so the bf16 x block fills packed tiles.
        tile_b = _round_up(max(B, 1), 16)
        return tile_b, tile_b, (1,)
    b128 = _round_up(B, 128)
    # >= 2 grid steps keeps both v7x TensorCores busy; cap tile at MAX_TILE_B
    # so per-step VMEM stays small (< a few MiB) on every generation.
    n_steps = max(2, -(-b128 // MAX_TILE_B))
    tile_b = min(MAX_TILE_B, _round_up(-(-b128 // n_steps), 128))
    b_pad = _round_up(B, tile_b)
    return tile_b, b_pad, (b_pad // tile_b,)


def dqn_forward(x, padded_params):
    """x: (B, 110) float32.

    padded_params: [(W1 bf16, b1 act), (W2 bf16, b2 act), (W3 bf16, b3 act),
                    (W4 f32,  b4 f32)] all zero-padded to 128 multiples,
    weights stored (in_features, out_features).
    """
    B = x.shape[0]
    in_pad = PADDED[0]
    out_pad = PADDED[-1]

    tile_b, b_pad, grid = _choose_batch_tiling(B)

    # Pad + pre-cast to bf16 once (fused into the same jit dispatch as the
    # kernel); the kernel's first dot consumes bf16 directly.
    x_pad = jnp.pad(x.astype(jnp.bfloat16),
                    ((0, b_pad - B), (0, in_pad - DIMS[0])))

    # Batch-tiled x / out; constant index_map keeps weights & biases
    # VMEM-resident across all grid steps (DMA'd once).
    x_spec = pl.BlockSpec((tile_b, in_pad), lambda i: (i, 0))
    out_spec = pl.BlockSpec((tile_b, out_pad), lambda i: (i, 0))
    const = lambda shape: pl.BlockSpec(shape, lambda i: (0, 0))

    flat_params = []
    in_specs = [x_spec]
    for w, b in padded_params:
        flat_params += [w, b]
        in_specs += [const(w.shape), const(b.shape)]

    flops = 2 * b_pad * sum(PADDED[i] * PADDED[i + 1] for i in range(4))
    bytes_accessed = (x_pad.size * x_pad.dtype.itemsize
                      + b_pad * out_pad * 4
                      + sum(w.size * w.dtype.itemsize + b.size * b.dtype.itemsize
                            for w, b in padded_params))

    out = pl.pallas_call(
        make_dqn_kernel(_bf16_elementwise_ok()),
        out_shape=jax.ShapeDtypeStruct((b_pad, out_pad), jnp.float32),
        grid=grid,
        in_specs=in_specs,
        out_specs=out_spec,
        compiler_params=pltpu.CompilerParams(
            dimension_semantics=("parallel",),
            vmem_limit_bytes=32 * 1024 * 1024),
        cost_estimate=pl.CostEstimate(
            flops=flops, transcendentals=0, bytes_accessed=bytes_accessed),
    )(x_pad, *flat_params)

    # TODO(synk): downstream consumers that tolerate padded/bf16 Q-values could
    # take the (b_pad, 256) block directly and skip this slice.
    return out[:B, :DIMS[-1]]


# jit the whole wrapper: pad + cast + kernel + slice become one dispatch.
dqn_forward_jit = jax.jit(dqn_forward)


def init_linear(key, in_features, out_features):
    # Mimic torch.nn.Linear default init: U(-1/sqrt(in), 1/sqrt(in)).
    kw, kb = jax.random.split(key)
    bound = 1.0 / jnp.sqrt(jnp.float32(in_features))
    # Stored as (in, out) so the kernel does x @ W (PyTorch stores (out, in)).
    w = jax.random.uniform(kw, (in_features, out_features), jnp.float32,
                           minval=-bound, maxval=bound)
    b = jax.random.uniform(kb, (1, out_features), jnp.float32,
                           minval=-bound, maxval=bound)
    return w, b


def prepare_params(params):
    """Zero-pad every layer to 128-multiples; bf16 weights for layers 1-3,
    f32 weights/bias for the final head layer (correctness of Q-value argmax)."""
    act_dtype = jnp.bfloat16 if _bf16_elementwise_ok() else jnp.float32
    padded = []
    n = len(params)
    for i, (w, b) in enumerate(params):
        in_p, out_p = PADDED[i], PADDED[i + 1]
        w_p = jnp.pad(w, ((0, in_p - w.shape[0]), (0, out_p - w.shape[1])))
        b_p = jnp.pad(b, ((0, 0), (0, out_p - b.shape[1])))
        if i < n - 1:
            padded.append((w_p.astype(jnp.bfloat16), b_p.astype(act_dtype)))
        else:
            padded.append((w_p.astype(jnp.float32), b_p.astype(jnp.float32)))
    return padded


def reference_forward_f32(x, params):
    # Pure f32 forward, matches the original PyTorch module semantics.
    h = x
    for i, (w, b) in enumerate(params):
        h = h @ w + b
        if i < len(params) - 1:
            h = jnp.maximum(h, 0.0)
    return h


def reference_forward_match(x, params):
    # Mirrors the kernel's exact dtype choices (bf16 MXU operands for layers
    # 1-3, act_dtype bias/ReLU, f32 final layer).
    act_dtype = jnp.bfloat16 if _bf16_elementwise_ok() else jnp.float32
    h = x.astype(jnp.bfloat16)
    for w, b in params[:-1]:
        y = jnp.dot(h, w.astype(jnp.bfloat16), preferred_element_type=jnp.float32)
        y = y.astype(act_dtype) + b.astype(act_dtype)
        h = jnp.maximum(y, 0.0).astype(jnp.bfloat16)
    w4, b4 = params[-1]
    return jnp.dot(h.astype(jnp.float32), w4,
                   preferred_element_type=jnp.float32) + b4


if __name__ == "__main__":
    key = jax.random.PRNGKey(0)
    k_x, k1, k2, k3, k4 = jax.random.split(key, 5)

    B = 8
    params = [
        init_linear(k1, DIMS[0], DIMS[1]),
        init_linear(k2, DIMS[1], DIMS[2]),
        init_linear(k3, DIMS[2], DIMS[3]),
        init_linear(k4, DIMS[3], DIMS[4]),
    ]
    padded_params = prepare_params(params)

    x = jax.random.normal(k_x, (B, DIMS[0]), jnp.float32)

    out = jax.block_until_ready(dqn_forward_jit(x, padded_params))
    assert out.shape == (B, DIMS[-1]), out.shape

    # Tight check vs a reference that mirrors the kernel's mixed precision.
    ref_match = reference_forward_match(x, params)
    assert jnp.allclose(out, ref_match, atol=1e-2, rtol=1e-2), \
        "mismatch vs kernel-matched reference"

    # Looser sanity check vs the full-f32 PyTorch-equivalent forward
    # (bf16 MXU operands on layers 1-3 introduce ~1% numerical differences).
    ref_f32 = reference_forward_f32(x, params)
    assert jnp.allclose(out, ref_f32, atol=5e-2, rtol=5e-2), \
        "mismatch vs f32 reference"

    print("KERNEL_OK")
</pallas_src>

<mosaic_0001>
module attributes {stable_mosaic.version = 11 : i64} {
  func.func @dqn_kernel(%arg0: i32, %arg1: memref<16x128xbf16, #tpu.memory_space<vmem>>, %arg2: memref<128x256xbf16, #tpu.memory_space<vmem>>, %arg3: memref<1x256xf32, #tpu.memory_space<vmem>>, %arg4: memref<256x256xbf16, #tpu.memory_space<vmem>>, %arg5: memref<1x256xf32, #tpu.memory_space<vmem>>, %arg6: memref<256x256xbf16, #tpu.memory_space<vmem>>, %arg7: memref<1x256xf32, #tpu.memory_space<vmem>>, %arg8: memref<256x256xf32, #tpu.memory_space<vmem>>, %arg9: memref<1x256xf32, #tpu.memory_space<vmem>>, %arg10: memref<16x256xf32, #tpu.memory_space<vmem>>) attributes {dimension_semantics = [#tpu.dimension_semantics<parallel>], iteration_bounds = array<i64: 1>, scalar_prefetch = 0 : i64, scratch_operands = 0 : i64, tpu.core_type = #tpu.core_type<tc>, window_params = [{transform_indices = @transform_0, window_bounds = array<i64: 16, 128>}, {pipeline_mode = #tpu.pipeline_mode<synchronous>, transform_indices = @transform_1, window_bounds = array<i64: 128, 256>}, {pipeline_mode = #tpu.pipeline_mode<synchronous>, transform_indices = @transform_2, window_bounds = array<i64: 1, 256>}, {pipeline_mode = #tpu.pipeline_mode<synchronous>, transform_indices = @transform_3, window_bounds = array<i64: 256, 256>}, {pipeline_mode = #tpu.pipeline_mode<synchronous>, transform_indices = @transform_4, window_bounds = array<i64: 1, 256>}, {pipeline_mode = #tpu.pipeline_mode<synchronous>, transform_indices = @transform_5, window_bounds = array<i64: 256, 256>}, {pipeline_mode = #tpu.pipeline_mode<synchronous>, transform_indices = @transform_6, window_bounds = array<i64: 1, 256>}, {pipeline_mode = #tpu.pipeline_mode<synchronous>, transform_indices = @transform_7, window_bounds = array<i64: 256, 256>}, {pipeline_mode = #tpu.pipeline_mode<synchronous>, transform_indices = @transform_8, window_bounds = array<i64: 1, 256>}, {transform_indices = @transform_9, window_bounds = array<i64: 16, 256>}]} {
    %c0 = arith.constant 0 : index
    %c0_0 = arith.constant 0 : index
    %0 = vector.load %arg1[%c0, %c0_0] : memref<16x128xbf16, #tpu.memory_space<vmem>>, vector<16x128xbf16>
    %c0_1 = arith.constant 0 : index
    %c0_2 = arith.constant 0 : index
    %1 = vector.load %arg2[%c0_1, %c0_2] : memref<128x256xbf16, #tpu.memory_space<vmem>>, vector<128x256xbf16>
    %cst = arith.constant dense<0.000000e+00> : vector<16x256xf32>
    %2 = tpu.matmul %0, %1, %cst {dimension_numbers = #tpu.dot_dimension_numbers<[1], [0], [0], [1], [0, 0, 1, 1], [], []>} : vector<16x128xbf16>, vector<128x256xbf16>, vector<16x256xf32> -> vector<16x256xf32>
    %c0_3 = arith.constant 0 : index
    %c0_4 = arith.constant 0 : index
    %3 = vector.load %arg3[%c0_3, %c0_4] : memref<1x256xf32, #tpu.memory_space<vmem>>, vector<1x256xf32>
    %4 = vector.broadcast %3 : vector<1x256xf32> to vector<16x256xf32>
    %5 = arith.addf %2, %4 : vector<16x256xf32>
    %cst_5 = arith.constant 0.000000e+00 : f32
    %6 = vector.broadcast %cst_5 : f32 to vector<16x256xf32>
    %7 = arith.maximumf %5, %6 : vector<16x256xf32>
    %8 = arith.truncf %7 : vector<16x256xf32> to vector<16x256xbf16>
    %c0_6 = arith.constant 0 : index
    %c0_7 = arith.constant 0 : index
    %9 = vector.load %arg4[%c0_6, %c0_7] : memref<256x256xbf16, #tpu.memory_space<vmem>>, vector<256x256xbf16>
    %cst_8 = arith.constant dense<0.000000e+00> : vector<16x256xf32>
    %10 = tpu.matmul %8, %9, %cst_8 {dimension_numbers = #tpu.dot_dimension_numbers<[1], [0], [0], [1], [0, 0, 1, 1], [], []>} : vector<16x256xbf16>, vector<256x256xbf16>, vector<16x256xf32> -> vector<16x256xf32>
    %c0_9 = arith.constant 0 : index
    %c0_10 = arith.constant 0 : index
    %11 = vector.load %arg5[%c0_9, %c0_10] : memref<1x256xf32, #tpu.memory_space<vmem>>, vector<1x256xf32>
    %12 = vector.broadcast %11 : vector<1x256xf32> to vector<16x256xf32>
    %13 = arith.addf %10, %12 : vector<16x256xf32>
    %cst_11 = arith.constant 0.000000e+00 : f32
    %14 = vector.broadcast %cst_11 : f32 to vector<16x256xf32>
    %15 = arith.maximumf %13, %14 : vector<16x256xf32>
    %16 = arith.truncf %15 : vector<16x256xf32> to vector<16x256xbf16>
    %c0_12 = arith.constant 0 : index
    %c0_13 = arith.constant 0 : index
    %17 = vector.load %arg6[%c0_12, %c0_13] : memref<256x256xbf16, #tpu.memory_space<vmem>>, vector<256x256xbf16>
    %cst_14 = arith.constant dense<0.000000e+00> : vector<16x256xf32>
    %18 = tpu.matmul %16, %17, %cst_14 {dimension_numbers = #tpu.dot_dimension_numbers<[1], [0], [0], [1], [0, 0, 1, 1], [], []>} : vector<16x256xbf16>, vector<256x256xbf16>, vector<16x256xf32> -> vector<16x256xf32>
    %c0_15 = arith.constant 0 : index
    %c0_16 = arith.constant 0 : index
    %19 = vector.load %arg7[%c0_15, %c0_16] : memref<1x256xf32, #tpu.memory_space<vmem>>, vector<1x256xf32>
    %20 = vector.broadcast %19 : vector<1x256xf32> to vector<16x256xf32>
    %21 = arith.addf %18, %20 : vector<16x256xf32>
    %cst_17 = arith.constant 0.000000e+00 : f32
    %22 = vector.broadcast %cst_17 : f32 to vector<16x256xf32>
    %23 = arith.maximumf %21, %22 : vector<16x256xf32>
    %24 = arith.truncf %23 : vector<16x256xf32> to vector<16x256xbf16>
    %25 = arith.extf %24 : vector<16x256xbf16> to vector<16x256xf32>
    %c0_18 = arith.constant 0 : index
    %c0_19 = arith.constant 0 : index
    %26 = vector.load %arg8[%c0_18, %c0_19] : memref<256x256xf32, #tpu.memory_space<vmem>>, vector<256x256xf32>
    %cst_20 = arith.constant dense<0.000000e+00> : vector<16x256xf32>
    %27 = tpu.matmul %25, %26, %cst_20 {dimension_numbers = #tpu.dot_dimension_numbers<[1], [0], [0], [1], [0, 0, 1, 1], [], []>} : vector<16x256xf32>, vector<256x256xf32>, vector<16x256xf32> -> vector<16x256xf32>
    %c0_21 = arith.constant 0 : index
    %c0_22 = arith.constant 0 : index
    %28 = vector.load %arg9[%c0_21, %c0_22] : memref<1x256xf32, #tpu.memory_space<vmem>>, vector<1x256xf32>
    %29 = vector.broadcast %28 : vector<1x256xf32> to vector<16x256xf32>
    %30 = arith.addf %27, %29 : vector<16x256xf32>
    %c0_23 = arith.constant 0 : index
    %c0_24 = arith.constant 0 : index
    %31 = vector.load %arg10[%c0_23, %c0_24] : memref<16x256xf32, #tpu.memory_space<vmem>>, vector<16x256xf32>
    tpu.vector_store %arg10[%c0_23, %c0_24], %30 {strides = array<i32>} : memref<16x256xf32, #tpu.memory_space<vmem>>, vector<16x256xf32>,
    return
  }
  func.func @transform_0(%arg0: i32) -> (i32, i32) {
    %c0_i32 = arith.constant 0 : i32
    %c0_i32_0 = arith.constant 0 : i32
    return %arg0, %c0_i32 : i32, i32
  }
  func.func @transform_1(%arg0: i32) -> (i32, i32) {
    %c0_i32 = arith.constant 0 : i32
    %c0_i32_0 = arith.constant 0 : i32
    %c0_i32_1 = arith.constant 0 : i32
    return %c0_i32, %c0_i32_0 : i32, i32
  }
  func.func @transform_2(%arg0: i32) -> (i32, i32) {
    %c0_i32 = arith.constant 0 : i32
    %c0_i32_0 = arith.constant 0 : i32
    %c0_i32_1 = arith.constant 0 : i32
    return %c0_i32, %c0_i32_0 : i32, i32
  }
  func.func @transform_3(%arg0: i32) -> (i32, i32) {
    %c0_i32 = arith.constant 0 : i32
    %c0_i32_0 = arith.constant 0 : i32
    %c0_i32_1 = arith.constant 0 : i32
    return %c0_i32, %c0_i32_0 : i32, i32
  }
  func.func @transform_4(%arg0: i32) -> (i32, i32) {
    %c0_i32 = arith.constant 0 : i32
    %c0_i32_0 = arith.constant 0 : i32
    %c0_i32_1 = arith.constant 0 : i32
    return %c0_i32, %c0_i32_0 : i32, i32
  }
  func.func @transform_5(%arg0: i32) -> (i32, i32) {
    %c0_i32 = arith.constant 0 : i32
    %c0_i32_0 = arith.constant 0 : i32
    %c0_i32_1 = arith.constant 0 : i32
    return %c0_i32, %c0_i32_0 : i32, i32
  }
  func.func @transform_6(%arg0: i32) -> (i32, i32) {
    %c0_i32 = arith.constant 0 : i32
    %c0_i32_0 = arith.constant 0 : i32
    %c0_i32_1 = arith.constant 0 : i32
    return %c0_i32, %c0_i32_0 : i32, i32
  }
  func.func @transform_7(%arg0: i32) -> (i32, i32) {
    %c0_i32 = arith.constant 0 : i32
    %c0_i32_0 = arith.constant 0 : i32
    %c0_i32_1 = arith.constant 0 : i32
    return %c0_i32, %c0_i32_0 : i32, i32
  }
  func.func @transform_8(%arg0: i32) -> (i32, i32) {
    %c0_i32 = arith.constant 0 : i32
    %c0_i32_0 = arith.constant 0 : i32
    %c0_i32_1 = arith.constant 0 : i32
    return %c0_i32, %c0_i32_0 : i32, i32
  }
  func.func @transform_9(%arg0: i32) -> (i32, i32) {
    %c0_i32 = arith.constant 0 : i32
    %c0_i32_0 = arith.constant 0 : i32
    return %arg0, %c0_i32 : i32, i32
  }
}

</mosaic_0001>

<bundles_post_ra>
// kernel: dqn_forward.1
= control target key start
LH: loop header
LB: loop body
LE: loop exit
PB: predicated region body
PF: predicated region fallthrough
CT: control target
= control target key end

     0   :  { %14 = vsyncpa [#allocation3], 0  ;;  %s1334_s0 = inlined_call_operand.vmem [shape: bf16[16,128], index: 0, kind: input, shape index: {}]   ;;  %s1335_s1 = inlined_call_operand.hbm [shape: bf16[128,256], index: 1, kind: input, shape index: {}]   ;;  %s1336_s2 = inlined_call_operand.vmem [shape: f32[1,256], index: 2, kind: input, shape index: {}]   ;;  %s1337_s3 = inlined_call_operand.hbm [shape: bf16[256,256], index: 3, kind: input, shape index: {}]   ;;  %s1338_s4 = inlined_call_operand.vmem [shape: f32[1,256], index: 4, kind: input, shape index: {}]   ;;  %s1339_s5 = inlined_call_operand.hbm [shape: bf16[256,256], index: 5, kind: input, shape index: {}]   ;;  %s1340_s6 = inlined_call_operand.vmem [shape: f32[1,256], index: 6, kind: input, shape index: {}]   ;;  %s1341_s7 = inlined_call_operand.hbm [shape: f32[256,256], index: 7, kind: input, shape index: {}]   ;;  %s1342_s8 = inlined_call_operand.vmem [shape: f32[1,256], index: 8, kind: input, shape index: {}]   ;;  %s1343_s9 = inlined_call_operand.vmem [shape: f32[16,256], index: 9, kind: output, shape index: {}]  }
   0x1   :  { %15 = vsyncpa [#allocation5], 0 }
   0x2   :  { %16 = vsyncpa [#allocation8], 0  ;;  %s1224_s30 = smov [#allocation4]   ;;  %s1225_s11 = smov [#allocation2]  }
   0x3   :  { %s38_s10 = sshll.u32 %s1224_s30, 4  ;;  %s24_s12 = sshll.u32 %s1225_s11, 4  ;;  %s39_s10 = int_to_ptr.vmem [resolvable:$true] %s38_s10  ;;  %s25_s12 = int_to_ptr.vmem [resolvable:$true] %s24_s12 }
   0x4   :  { %s1146_s13 = scalar_lea.vmem %s39_s10, 4096  ;;  %p1151_p1 = scmp.lt.s32.totalorder %s39_s10, %s39_s10 }
   0x5   :  { %p1147_p0 = scmp.ne.s32.totalorder %s39_s10, %s1146_s13  ;;  %p1152_p2 = scmp.lt.s32.totalorder %s1146_s13, %s1146_s13 }
   0x7   :  { %p1153_p3 = por %p1152_p2, %p1151_p1 }
   0x9   :  { %p1154_p4 = pnand %p1153_p3, %p1147_p0 }
   0xb   :  { %1157 = shalt.err (!%p1154_p4)
}
   0xc   :  { %s1226_s14 = smov 128   ;;  %s1227_s15 = smov 8  }
   0xd   :  { %44 = dma.hbm_to_vmem [thread:$0]  %s1337_s3, 4096, %s39_s10, [#allocation5], %s1226_s14, %s1226_s14, %s1227_s15  }
   0xe   :  { %s1166_s18 = scalar_lea.vmem %s25_s12, 2048  ;;  %p1171_p6 = scmp.lt.s32.totalorder %s25_s12, %s25_s12 }
   0xf   :  { %p1167_p5 = scmp.ne.s32.totalorder %s25_s12, %s1166_s18  ;;  %p1172_p7 = scmp.lt.s32.totalorder %s1166_s18, %s1166_s18 }
  0x11   :  { %p1173_p8 = por %p1172_p7, %p1171_p6 }
  0x13   :  { %p1174_p9 = pnand %p1173_p8, %p1167_p5 }
  0x15   :  { %1177 = shalt.err (!%p1174_p9)
}
  0x16   :  { %30 = dma.hbm_to_vmem [thread:$0]  %s1335_s1, 2048, %s25_s12, [#allocation3], %s1226_s14, %s1226_s14, %s1227_s15  }
  0x17   :  { %s1228_s21 = smov [#allocation6]   ;;  %s1229_s23 = smov [#allocation7]  }
  0x18   :  { %s52_s22 = sshll.u32 %s1228_s21, 4  ;;  %s66_s24 = sshll.u32 %s1229_s23, 4  ;;  %s53_s22 = int_to_ptr.vmem [resolvable:$true] %s52_s22  ;;  %s67_s24 = int_to_ptr.vmem [resolvable:$true] %s66_s24 }
  0x19   :  { %s1186_s25 = scalar_lea.vmem %s53_s22, 4096  ;;  %p1191_p11 = scmp.lt.s32.totalorder %s53_s22, %s53_s22 }
  0x1a   :  { %p1187_p10 = scmp.ne.s32.totalorder %s53_s22, %s1186_s25  ;;  %p1192_p12 = scmp.lt.s32.totalorder %s1186_s25, %s1186_s25 }
  0x1c   :  { %p1193_p13 = por %p1192_p12, %p1191_p11 }
  0x1e   :  { %p1194_p0 = pnand %p1193_p13, %p1187_p10 }
  0x20   :  { %1197 = shalt.err (!%p1194_p0)
}
  0x21   :  { %58 = dma.hbm_to_vmem [thread:$0]  %s1339_s5, 4096, %s53_s22, [#allocation5], %s1226_s14, %s1226_s14, %s1227_s15  }
  0x22   :  { %s1206_s27 = scalar_lea.vmem %s67_s24, 8192  ;;  %p1211_p2 = scmp.lt.s32.totalorder %s67_s24, %s67_s24 }
  0x23   :  { %p1207_p1 = scmp.ne.s32.totalorder %s67_s24, %s1206_s27  ;;  %p1212_p3 = scmp.lt.s32.totalorder %s1206_s27, %s1206_s27 }
  0x25   :  { %p1213_p4 = por %p1212_p3, %p1211_p2 }
  0x27   :  { %p1214_p5 = pnand %p1213_p4, %p1207_p1 }
  0x29   :  { %1217 = shalt.err (!%p1214_p5)
}
  0x2a   :  { %s1230_s1 = smov 256   ;;  %s1231_s28 = smov 16  }
  0x2b   :  { %72 = dma.hbm_to_vmem [thread:$0]  %s1341_s7, 8192, %s67_s24, [#allocation8], %s1230_s1, %s1230_s1, %s1231_s28  }
  0x2c   :  { %1218 = dma.done.wait [#allocation3], 2048  }
  0x2d   :  { %1219 = vsyncadd [#allocation3], 4294965248 }
  0x2e   :  { %1220 = dma.done.wait [#allocation5], 8192  }
  0x2f   :  { %1221 = vsyncadd [#allocation5], 4294959104 }
  0x30   :  { %1222 = dma.done.wait [#allocation8], 8192  }
  0x31   :  { %1223 = vsyncadd [#allocation8], 4294959104  ;;  %v1232_v0 = vmov 0   ;;  %v1017_v1 = vld [vmem:[#allocation2 + $0x74] ss:$8 sps:$4 sm:$0xff]   ;;  %v1041_v27 = vld [vmem:[%s1334_s0] sm:$0xff]  }
  0x32   :  { %236 = vmatprep.mubr.bf16.mxu0 %v1232_v0  ;;  %v1019_v2 = vld [vmem:[#allocation2 + $0x70] ss:$8 sps:$4 sm:$0xff]   ;;  %204 = vmatprep.subr.bf16.mxu0 %v1017_v1  ;;  %v1020_v3 = vld [vmem:[#allocation2 + $0x64] ss:$8 sps:$4 sm:$0xff]   ;;  %v1022_v4 = vld [vmem:[#allocation2 + $0x60] ss:$8 sps:$4 sm:$0xff]  }
  0x33   :  { %205 = vmatpush1.bf16.msra.mxu0 %v1019_v2  ;;  %v1023_v5 = vld [vmem:[#allocation2 + $0x54] ss:$8 sps:$4 sm:$0xff]   ;;  %v1025_v6 = vld [vmem:[#allocation2 + $0x50] ss:$8 sps:$4 sm:$0xff]   ;;  %v1026_v7 = vld [vmem:[#allocation2 + $0x44] ss:$8 sps:$4 sm:$0xff]  }
  0x34   :  { %206 = vmatprep.subr.bf16.mxu0 %v1020_v3  ;;  %v1028_v8 = vld [vmem:[#allocation2 + $0x40] ss:$8 sps:$4 sm:$0xff]   ;;  %v1029_v9 = vld [vmem:[#allocation2 + $0x34] ss:$8 sps:$4 sm:$0xff]   ;;  %v1044_v11 = vld [vmem:[#allocation4 + $0x70] ss:$8 sps:$4 sm:$0xff]  }
  0x35   :  { %v1042_v10 = vld [vmem:[#allocation4 + $0x74] ss:$8 sps:$4 sm:$0xff]   ;;  %v1045_v12 = vld [vmem:[#allocation4 + $0x64] ss:$8 sps:$4 sm:$0xff]   ;;  %v1031_v13 = vld [vmem:[#allocation2 + $0x30] ss:$8 sps:$4 sm:$0xff]  }
  0x36   :  { %457 = vmatprep.subr.bf16.mxu1 %v1042_v10  ;;  %v1047_v14 = vld [vmem:[#allocation4 + $0x60] ss:$8 sps:$4 sm:$0xff]   ;;  %v1032_v15 = vld [vmem:[#allocation2 + $0x24] ss:$8 sps:$4 sm:$0xff]   ;;  %v1048_v16 = vld [vmem:[#allocation4 + $0x54] ss:$8 sps:$4 sm:$0xff]  }
  0x37   :  { %207 = vmatpush1.bf16.msra.mxu0 %v1022_v4  ;;  %458 = vmatpush1.bf16.msra.mxu1 %v1044_v11  ;;  %v1034_v17 = vld [vmem:[#allocation2 + $0x20] ss:$8 sps:$4 sm:$0xff]   ;;  %v1050_v18 = vld [vmem:[#allocation4 + $0x50] ss:$8 sps:$4 sm:$0xff]   ;;  %v1035_v19 = vld [vmem:[#allocation2 + $0x14] ss:$8 sps:$4 sm:$0xff]  }
  0x38   :  { %208 = vmatprep.subr.bf16.mxu0 %v1023_v5  ;;  %459 = vmatprep.subr.bf16.mxu1 %v1045_v12  ;;  %v1051_v20 = vld [vmem:[#allocation4 + $0x44] ss:$8 sps:$4 sm:$0xff]   ;;  %v1037_v21 = vld [vmem:[#allocation2 + $0x10] ss:$8 sps:$4 sm:$0xff]   ;;  %v1053_v22 = vld [vmem:[#allocation4 + $0x40] ss:$8 sps:$4 sm:$0xff]   ;;  %v108_v12 = vlaneseq }
  0x39   :  { %v1038_v23 = vld [vmem:[#allocation2 + $0x4] ss:$8 sps:$4 sm:$0xff]   ;;  %v1054_v24 = vld [vmem:[#allocation4 + $0x34] ss:$8 sps:$4 sm:$0xff]   ;;  %v1040_v25 = vld [vmem:[#allocation2] ss:$8 sps:$4 sm:$0xff]  }
  0x3a   :  { %v1056_v26 = vld [vmem:[#allocation4 + $0x30] ss:$8 sps:$4 sm:$0xff]   ;;  %v1057_v28 = vld [vmem:[#allocation4 + $0x24] ss:$8 sps:$4 sm:$0xff]   ;;  %v1059_v29 = vld [vmem:[#allocation4 + $0x20] ss:$8 sps:$4 sm:$0xff]  }
  0x3b   :  { %209 = vmatpush1.bf16.msra.mxu0 %v1025_v6  ;;  %460 = vmatpush1.bf16.msra.mxu1 %v1047_v14  ;;  %v1060_v30 = vld [vmem:[#allocation4 + $0x14] ss:$8 sps:$4 sm:$0xff]   ;;  %v1062_v31 = vld [vmem:[#allocation4 + $0x10] ss:$8 sps:$4 sm:$0xff]   ;;  %v1063_v32 = vld [vmem:[#allocation4 + $0x4] ss:$8 sps:$4 sm:$0xff]  }
  0x3c   :  { %210 = vmatprep.subr.bf16.mxu0 %v1026_v7  ;;  %461 = vmatprep.subr.bf16.mxu1 %v1048_v16  ;;  %v1065_v33 = vld [vmem:[#allocation4] ss:$8 sps:$4 sm:$0xff]   ;;  %v1066_v34 = vld [vmem:[#allocation4 + $0xf4] ss:$8 sps:$4 sm:$0xff]   ;;  %v1068_v35 = vld [vmem:[#allocation4 + $0xf0] ss:$8 sps:$4 sm:$0xff]  }
  0x3d   :  { %v1069_v36 = vld [vmem:[#allocation4 + $0xe4] ss:$8 sps:$4 sm:$0xff]   ;;  %v1071_v37 = vld [vmem:[#allocation4 + $0xe0] ss:$8 sps:$4 sm:$0xff]   ;;  %v1072_v38 = vld [vmem:[#allocation4 + $0xd4] ss:$8 sps:$4 sm:$0xff]  }
  0x3e   :  { %v1074_v39 = vld [vmem:[#allocation4 + $0xd0] ss:$8 sps:$4 sm:$0xff]   ;;  %v1075_v40 = vld [vmem:[#allocation4 + $0xc4] ss:$8 sps:$4 sm:$0xff]   ;;  %v1077_v41 = vld [vmem:[#allocation4 + $0xc0] ss:$8 sps:$4 sm:$0xff]  }
  0x3f   :  { %211 = vmatpush1.bf16.msra.mxu0 %v1028_v8  ;;  %462 = vmatpush1.bf16.msra.mxu1 %v1050_v18  ;;  %v1078_v42 = vld [vmem:[#allocation4 + $0xb4] ss:$8 sps:$4 sm:$0xff]   ;;  %v1080_v43 = vld [vmem:[#allocation4 + $0xb0] ss:$8 sps:$4 sm:$0xff]   ;;  %v1081_v44 = vld [vmem:[#allocation4 + $0xa4] ss:$8 sps:$4 sm:$0xff]  }
  0x40   :  { %212 = vmatprep.subr.bf16.mxu0 %v1029_v9  ;;  %463 = vmatprep.subr.bf16.mxu1 %v1051_v20  ;;  %v1083_v45 = vld [vmem:[#allocation4 + $0xa0] ss:$8 sps:$4 sm:$0xff]   ;;  %v1084_v46 = vld [vmem:[#allocation4 + $0x94] ss:$8 sps:$4 sm:$0xff]   ;;  %v1086_v47 = vld [vmem:[#allocation4 + $0x90] ss:$8 sps:$4 sm:$0xff]  }
  0x41   :  { %v1087_v48 = vld [vmem:[#allocation4 + $0x84] ss:$8 sps:$4 sm:$0xff]   ;;  %v1089_v49 = vld [vmem:[#allocation4 + $0x80] ss:$8 sps:$4 sm:$0xff]   ;;  %v1090_v50 = vld [vmem:[#allocation6 + $0x70] ss:$8 sps:$4 sm:$0xff]  }
  0x42   :  { %v1092_v51 = vld [vmem:[#allocation6 + $0x74] ss:$8 sps:$4 sm:$0xff]   ;;  %v1095_v52 = vld [vmem:[#allocation6 + $0x64] ss:$8 sps:$4 sm:$0xff]   ;;  %v1093_v53 = vld [vmem:[#allocation6 + $0x60] ss:$8 sps:$4 sm:$0xff]  }
  0x43   :  { %213 = vmatpush1.bf16.msra.mxu0 %v1031_v13  ;;  %464 = vmatpush1.bf16.msra.mxu1 %v1053_v22  ;;  %v1098_v54 = vld [vmem:[#allocation6 + $0x54] ss:$8 sps:$4 sm:$0xff]   ;;  %v1096_v55 = vld [vmem:[#allocation6 + $0x50] ss:$8 sps:$4 sm:$0xff]   ;;  %v1101_v56 = vld [vmem:[#allocation6 + $0x44] ss:$8 sps:$4 sm:$0xff]  }
  0x44   :  { %214 = vmatprep.subr.bf16.mxu0 %v1032_v15  ;;  %465 = vmatprep.subr.bf16.mxu1 %v1054_v24  ;;  %v1099_v57 = vld [vmem:[#allocation6 + $0x40] ss:$8 sps:$4 sm:$0xff]   ;;  %v1104_v58 = vld [vmem:[#allocation6 + $0x34] ss:$8 sps:$4 sm:$0xff]   ;;  %v1102_v59 = vld [vmem:[#allocation6 + $0x30] ss:$8 sps:$4 sm:$0xff]  }
  0x45   :  { %v1107_v60 = vld [vmem:[#allocation6 + $0x24] ss:$8 sps:$4 sm:$0xff]   ;;  %v1105_v61 = vld [vmem:[#allocation6 + $0x20] ss:$8 sps:$4 sm:$0xff]   ;;  %v1110_v62 = vld [vmem:[#allocation6 + $0x14] ss:$8 sps:$4 sm:$0xff]  }
  0x46   :  { %v1108_v63 = vld [vmem:[#allocation6 + $0x10] ss:$8 sps:$4 sm:$0xff]   ;;  %v1113_v0 = vld [vmem:[#allocation6 + $0x4] ss:$8 sps:$4 sm:$0xff]   ;;  %v1111_v1 = vld [vmem:[#allocation6] ss:$8 sps:$4 sm:$0xff]  }
  0x47   :  { %215 = vmatpush1.bf16.msra.mxu0 %v1034_v17  ;;  %466 = vmatpush1.bf16.msra.mxu1 %v1056_v26  ;;  %v1116_v2 = vld [vmem:[#allocation6 + $0xf4] ss:$8 sps:$4 sm:$0xff]   ;;  %v1114_v3 = vld [vmem:[#allocation6 + $0xf0] ss:$8 sps:$4 sm:$0xff]   ;;  %v1119_v4 = vld [vmem:[#allocation6 + $0xe4] ss:$8 sps:$4 sm:$0xff]  }
  0x48   :  { %216 = vmatprep.subr.bf16.mxu0 %v1035_v19  ;;  %467 = vmatprep.subr.bf16.mxu1 %v1057_v28  ;;  %v1117_v5 = vld [vmem:[#allocation6 + $0xe0] ss:$8 sps:$4 sm:$0xff]   ;;  %v1122_v6 = vld [vmem:[#allocation6 + $0xd4] ss:$8 sps:$4 sm:$0xff]   ;;  %v1120_v7 = vld [vmem:[#allocation6 + $0xd0] ss:$8 sps:$4 sm:$0xff]  }
  0x49   :  { %v1125_v8 = vld [vmem:[#allocation6 + $0xc4] ss:$8 sps:$4 sm:$0xff]   ;;  %v1123_v9 = vld [vmem:[#allocation6 + $0xc0] ss:$8 sps:$4 sm:$0xff]   ;;  %v1128_v10 = vld [vmem:[#allocation6 + $0xb4] ss:$8 sps:$4 sm:$0xff]  }
  0x4a   :  { %v1126_v11 = vld [vmem:[#allocation6 + $0xb0] ss:$8 sps:$4 sm:$0xff]   ;;  %v109_v13 = vshrl.u32 %v108_v12, 7  ;;  %v106_v16 = vld [vmem:[%s1336_s2] sm:$0x3] }
  0x4b   :  { %217 = vmatpush1.bf16.msra.mxu0 %v1037_v21  ;;  %468 = vmatpush1.bf16.msra.mxu1 %v1059_v29  ;;  %v821_v12 = vld [vmem:[#allocation7 + $0x1d0] sm:$0xff] }
  0x4c   :  { %218 = vmatprep.subr.bf16.mxu0 %v1038_v23  ;;  %469 = vmatprep.subr.bf16.mxu1 %v1060_v30  ;;  %v1298_v14 = vsub.s32 1, %v109_v13  ;;  %v1300_v15 = vsub.s32 0, %v109_v13  ;;  %v820_v13 = vld [vmem:[#allocation7 + $0x1c8] sm:$0xff] }
  0x4e   :  { %v115_v18 = vrot.slane %v106_v16, %v1298_v14  ;;  %v111_v19 = vrot.slane %v106_v16, %v1300_v15  ;;  %v819_v16 = vld [vmem:[#allocation7 + $0x1c0] sm:$0xff] }
  0x4f   :  { %219 = vmatpush1.bf16.msra.mxu0 %v1040_v25  ;;  %470 = vmatpush1.bf16.msra.mxu1 %v1062_v31 }
  0x50   :  { %471 = vmatprep.subr.bf16.mxu1 %v1063_v32  ;;  %710 = vmatprep.subr.bf16.mxu0 %v1092_v51  ;;  %v782_v51 = vld [vmem:[#allocation7 + $0x98] sm:$0xff] }
  0x52   :  { %237 = vmatmul.mubr.bf16.vlgmr.msra.gmra.mxu0 %v1041_v27 }
  0x53   :  { %472 = vmatpush1.bf16.msra.mxu1 %v1065_v33  ;;  %711 = vmatpush1.bf16.msra.mxu0 %v1090_v50  ;;  %v1131_v33 = vld [vmem:[#allocation6 + $0xa4] ss:$8 sps:$4 sm:$0xff]  }
  0x54   :  { %473 = vmatprep.subr.bf16.mxu1 %v1066_v34  ;;  %712 = vmatprep.subr.bf16.mxu0 %v1095_v52  ;;  %v1129_v34 = vld [vmem:[#allocation6 + $0xa0] ss:$8 sps:$4 sm:$0xff]   ;;  %v781_v52 = vld [vmem:[#allocation7 + $0x90] sm:$0xff] }
  0x55   :  { %v783_v50 = vld [vmem:[#allocation7 + $0xa0] sm:$0xff] }
  0x57   :  { %474 = vmatpush2.bf16.msra.mxu1 %v1068_v35  ;;  %713 = vmatpush1.bf16.msra.mxu0 %v1093_v53  ;;  %v1134_v35 = vld [vmem:[#allocation6 + $0x94] ss:$8 sps:$4 sm:$0xff]   ;;  %v780_v53 = vld [vmem:[#allocation7 + $0x88] sm:$0xff] }
  0x58   :  { %475 = vmatprep.subr.bf16.mxu1 %v1069_v36  ;;  %714 = vmatprep.subr.bf16.mxu0 %v1098_v54  ;;  %v1132_v36 = vld [vmem:[#allocation6 + $0x90] ss:$8 sps:$4 sm:$0xff]   ;;  %v779_v54 = vld [vmem:[#allocation7 + $0x80] sm:$0xff] }
  0x5b   :  { %476 = vmatpush2.bf16.msra.mxu1 %v1071_v37  ;;  %715 = vmatpush1.bf16.msra.mxu0 %v1096_v55  ;;  %v1137_v37 = vld [vmem:[#allocation6 + $0x84] ss:$8 sps:$4 sm:$0xff]   ;;  %v778_v55 = vld [vmem:[#allocation7 + $0x78] sm:$0xff] }
  0x5c   :  { %477 = vmatprep.subr.bf16.mxu1 %v1072_v38  ;;  %716 = vmatprep.subr.bf16.mxu0 %v1101_v56  ;;  %v1135_v38 = vld [vmem:[#allocation6 + $0x80] ss:$8 sps:$4 sm:$0xff]   ;;  %v777_v56 = vld [vmem:[#allocation7 + $0x70] sm:$0xff] }
  0x5f   :  { %478 = vmatpush2.bf16.msra.mxu1 %v1074_v39  ;;  %717 = vmatpush1.bf16.msra.mxu0 %v1099_v57  ;;  %v794_v39 = vld [vmem:[#allocation7 + $0xf8] sm:$0xff]  ;;  %v776_v57 = vld [vmem:[#allocation7 + $0x68] sm:$0xff] }
  0x60   :  { %479 = vmatprep.subr.bf16.mxu1 %v1075_v40  ;;  %718 = vmatprep.subr.bf16.mxu0 %v1104_v58  ;;  %v793_v40 = vld [vmem:[#allocation7 + $0xf0] sm:$0xff]  ;;  %v775_v58 = vld [vmem:[#allocation7 + $0x60] sm:$0xff] }
  0x63   :  { %480 = vmatpush2.bf16.msra.mxu1 %v1077_v41  ;;  %719 = vmatpush1.bf16.msra.mxu0 %v1102_v59  ;;  %v792_v41 = vld [vmem:[#allocation7 + $0xe8] sm:$0xff]  ;;  %v774_v59 = vld [vmem:[#allocation7 + $0x58] sm:$0xff] }
  0x64   :  { %481 = vmatprep.subr.bf16.mxu1 %v1078_v42  ;;  %720 = vmatprep.subr.bf16.mxu0 %v1107_v60  ;;  %v791_v42 = vld [vmem:[#allocation7 + $0xe0] sm:$0xff]  ;;  %v773_v60 = vld [vmem:[#allocation7 + $0x50] sm:$0xff] }
  0x67   :  { %482 = vmatpush2.bf16.msra.mxu1 %v1080_v43  ;;  %721 = vmatpush1.bf16.msra.mxu0 %v1105_v61  ;;  %v790_v43 = vld [vmem:[#allocation7 + $0xd8] sm:$0xff]  ;;  %v772_v61 = vld [vmem:[#allocation7 + $0x48] sm:$0xff] }
  0x68   :  { %483 = vmatprep.subr.bf16.mxu1 %v1081_v44  ;;  %722 = vmatprep.subr.bf16.mxu0 %v1110_v62  ;;  %v789_v44 = vld [vmem:[#allocation7 + $0xd0] sm:$0xff]  ;;  %v771_v62 = vld [vmem:[#allocation7 + $0x40] sm:$0xff] }
  0x6b   :  { %484 = vmatpush2.bf16.msra.mxu1 %v1083_v45  ;;  %723 = vmatpush1.bf16.msra.mxu0 %v1108_v63  ;;  %v788_v45 = vld [vmem:[#allocation7 + $0xc8] sm:$0xff]  ;;  %v770_v63 = vld [vmem:[#allocation7 + $0x38] sm:$0xff] }
  0x6c   :  { %485 = vmatprep.subr.bf16.mxu1 %v1084_v46  ;;  %724 = vmatprep.subr.bf16.mxu0 %v1113_v0  ;;  %v787_v46 = vld [vmem:[#allocation7 + $0xc0] sm:$0xff]  ;;  %v769_v0 = vld [vmem:[#allocation7 + $0x30] sm:$0xff] }
  0x6f   :  { %486 = vmatpush2.bf16.msra.mxu1 %v1086_v47  ;;  %725 = vmatpush1.bf16.msra.mxu0 %v1111_v1  ;;  %v786_v47 = vld [vmem:[#allocation7 + $0xb8] sm:$0xff]  ;;  %v768_v1 = vld [vmem:[#allocation7 + $0x28] sm:$0xff] }
  0x70   :  { %487 = vmatprep.subr.bf16.mxu1 %v1087_v48  ;;  %726 = vmatprep.subr.bf16.mxu0 %v1116_v2  ;;  %v785_v48 = vld [vmem:[#allocation7 + $0xb0] sm:$0xff]  ;;  %v767_v2 = vld [vmem:[#allocation7 + $0x20] sm:$0xff] }
  0x73   :  { %488 = vmatpush2.bf16.msra.mxu1 %v1089_v49  ;;  %727 = vmatpush2.bf16.msra.mxu0 %v1114_v3  ;;  %v784_v49 = vld [vmem:[#allocation7 + $0xa8] sm:$0xff]  ;;  %v766_v3 = vld [vmem:[#allocation7 + $0x18] sm:$0xff] }
  0x74   :  { %728 = vmatprep.subr.bf16.mxu0 %v1119_v4  ;;  %839 = vmatprep.subr.mxu1 %v794_v39  ;;  %v765_v4 = vld [vmem:[#allocation7 + $0x10] sm:$0xff] }
  0x77   :  { %729 = vmatpush2.bf16.msra.mxu0 %v1117_v5  ;;  %v764_v5 = vld [vmem:[#allocation7 + $0x8] sm:$0xff] }
  0x78   :  { %730 = vmatprep.subr.bf16.mxu0 %v1122_v6  ;;  %v763_v6 = vld [vmem:[#allocation7] sm:$0xff] }
  0x7b   :  { %731 = vmatpush2.bf16.msra.mxu0 %v1120_v7  ;;  %v826_v7 = vld [vmem:[#allocation7 + $0x1f8] sm:$0xff] }
  0x7c   :  { %732 = vmatprep.subr.bf16.mxu0 %v1125_v8  ;;  %v825_v8 = vld [vmem:[#allocation7 + $0x1f0] sm:$0xff] }
  0x7f   :  { %733 = vmatpush2.bf16.msra.mxu0 %v1123_v9  ;;  %v824_v9 = vld [vmem:[#allocation7 + $0x1e8] sm:$0xff] }
  0x80   :  { %734 = vmatprep.subr.bf16.mxu0 %v1128_v10  ;;  %v823_v10 = vld [vmem:[#allocation7 + $0x1e0] sm:$0xff] }
  0x83   :  { %735 = vmatpush2.bf16.msra.mxu0 %v1126_v11  ;;  %v822_v11 = vld [vmem:[#allocation7 + $0x1d8] sm:$0xff] }
  0x84   :  { %736 = vmatprep.subr.bf16.mxu0 %v1131_v33  ;;  %v285_v33 = vld [vmem:[%s1338_s4] sm:$0x3] }
  0x87   :  { %737 = vmatpush2.bf16.msra.mxu0 %v1129_v34 }
  0x88   :  { %738 = vmatprep.subr.bf16.mxu0 %v1134_v35  ;;  %v294_v35 = vrot.slane %v285_v33, %v1298_v14 }
  0x8b   :  { %739 = vmatpush2.bf16.msra.mxu0 %v1132_v36  ;;  %v290_v36 = vrot.slane %v285_v33, %v1300_v15 }
  0x8c   :  { %740 = vmatprep.subr.bf16.mxu0 %v1137_v37 }
  0x8f   :  { %741 = vmatpush2.bf16.msra.mxu0 %v1135_v38 }
 0x112   :  { %v238_v17 = vpop.f32.mrf.mxu0 }
 0x113   :  { %v239_v24 = vadd.f32 %v238_v17, %v111_v19  ;;  %v818_v17 = vld [vmem:[#allocation7 + $0x1b8] sm:$0xff] }
 0x114   :  { %v240_v20 = vpop.f32.mrf.mxu0 }
 0x115   :  { %v241_v22 = vadd.f32 %v240_v20, %v115_v18  ;;  %v247_v30 = vmax.f32 %v239_v24, 0.0  ;;  %v815_v20 = vld [vmem:[#allocation7 + $0x1a0] sm:$0xff] }
 0x116   :  { %v242_v21 = vpop.f32.mrf.mxu0  ;;  %v811_v24 = vld [vmem:[#allocation7 + $0x180] sm:$0xff] }
 0x117   :  { %v243_v23 = vadd.f32 %v242_v21, %v111_v19  ;;  %v248_v28 = vmax.f32 %v241_v22, 0.0  ;;  %v816_v19 = vld [vmem:[#allocation7 + $0x1a8] sm:$0xff]  ;;  %v814_v21 = vld [vmem:[#allocation7 + $0x198] sm:$0xff]  ;;  %v813_v22 = vld [vmem:[#allocation7 + $0x190] sm:$0xff] }
 0x118   :  { %v244_v25 = vpop.f32.mrf.mxu0 }
 0x119   :  { %v245_v26 = vadd.f32 %v244_v25, %v115_v18  ;;  %v249_v27 = vmax.f32 %v243_v23, 0.0  ;;  %v817_v18 = vld [vmem:[#allocation7 + $0x1b0] sm:$0xff]  ;;  %v812_v23 = vld [vmem:[#allocation7 + $0x188] sm:$0xff]  ;;  %v810_v25 = vld [vmem:[#allocation7 + $0x178] sm:$0xff] }
 0x11b   :  { %v250_v29 = vmax.f32 %v245_v26, 0.0  ;;  %v251_v32 = vpack.c.bf16 %v249_v27, %v247_v30  ;;  %v809_v26 = vld [vmem:[#allocation7 + $0x170] sm:$0xff]  ;;  %v808_v27 = vld [vmem:[#allocation7 + $0x168] sm:$0xff] }
 0x11c   :  { %v805_v30 = vld [vmem:[#allocation7 + $0x150] sm:$0xff] }
 0x11d   :  { %v252_v31 = vpack.c.bf16 %v250_v29, %v248_v28  ;;  %v807_v28 = vld [vmem:[#allocation7 + $0x160] sm:$0xff]  ;;  %v806_v29 = vld [vmem:[#allocation7 + $0x158] sm:$0xff] }
 0x11f   :  { %489 = vmatprep.mubr.bf16.mxu1 %v252_v31  ;;  %v804_v31 = vld [vmem:[#allocation7 + $0x148] sm:$0xff] }
 0x120   :  { %490 = vmatmul.mubr.bf16.vlgmr.msra.gmra.mxu1 %v251_v32  ;;  %v803_v32 = vld [vmem:[#allocation7 + $0x140] sm:$0xff] }
 0x121   :  { %840 = vmatpush1.msra.mxu1 %v793_v40 }
 0x122   :  { %841 = vmatprep.subr.mxu1 %v792_v41 }
 0x123   :  { %842 = vmatpush1.msra.mxu1 %v791_v42 }
 0x124   :  { %843 = vmatprep.subr.mxu1 %v790_v43 }
 0x125   :  { %844 = vmatpush1.msra.mxu1 %v789_v44 }
 0x126   :  { %845 = vmatprep.subr.mxu1 %v788_v45 }
 0x127   :  { %846 = vmatpush1.msra.mxu1 %v787_v46 }
 0x128   :  { %847 = vmatprep.subr.mxu1 %v786_v47 }
 0x129   :  { %848 = vmatpush1.msra.mxu1 %v785_v48 }
 0x12a   :  { %849 = vmatprep.subr.mxu1 %v784_v49 }
 0x12b   :  { %850 = vmatpush1.msra.mxu1 %v783_v50  ;;  %v802_v50 = vld [vmem:[#allocation7 + $0x138] sm:$0xff] }
 0x12c   :  { %851 = vmatprep.subr.mxu1 %v782_v51  ;;  %v801_v51 = vld [vmem:[#allocation7 + $0x130] sm:$0xff] }
 0x12d   :  { %852 = vmatpush1.msra.mxu1 %v781_v52  ;;  %v800_v52 = vld [vmem:[#allocation7 + $0x128] sm:$0xff] }
 0x12e   :  { %853 = vmatprep.subr.mxu1 %v780_v53  ;;  %v799_v53 = vld [vmem:[#allocation7 + $0x120] sm:$0xff] }
 0x12f   :  { %854 = vmatpush1.msra.mxu1 %v779_v54  ;;  %v798_v54 = vld [vmem:[#allocation7 + $0x118] sm:$0xff] }
 0x130   :  { %855 = vmatprep.subr.mxu1 %v778_v55  ;;  %v797_v55 = vld [vmem:[#allocation7 + $0x110] sm:$0xff] }
 0x131   :  { %856 = vmatpush1.msra.mxu1 %v777_v56  ;;  %v796_v56 = vld [vmem:[#allocation7 + $0x108] sm:$0xff] }
 0x132   :  { %857 = vmatprep.subr.mxu1 %v776_v57  ;;  %v795_v57 = vld [vmem:[#allocation7 + $0x100] sm:$0xff] }
 0x133   :  { %858 = vmatpush1.msra.mxu1 %v775_v58  ;;  %v538_v58 = vld [vmem:[%s1340_s6] sm:$0x3] }
 0x134   :  { %859 = vmatprep.subr.mxu1 %v774_v59  ;;  %v543_v59 = vrot.slane %v538_v58, %v1300_v15 }
 0x135   :  { %860 = vmatpush1.msra.mxu1 %v773_v60  ;;  %v547_v60 = vrot.slane %v538_v58, %v1298_v14 }
 0x136   :  { %861 = vmatprep.subr.mxu1 %v772_v61 }
 0x137   :  { %862 = vmatpush1.msra.mxu1 %v771_v62 }
 0x138   :  { %863 = vmatprep.subr.mxu1 %v770_v63 }
 0x139   :  { %864 = vmatpush1.msra.mxu1 %v769_v0 }
 0x13a   :  { %865 = vmatprep.subr.mxu1 %v768_v1 }
 0x13b   :  { %866 = vmatpush1.msra.mxu1 %v767_v2 }
 0x13c   :  { %867 = vmatprep.subr.mxu1 %v766_v3 }
 0x13d   :  { %868 = vmatpush1.msra.mxu1 %v765_v4 }
 0x13e   :  { %869 = vmatprep.subr.mxu1 %v764_v5 }
 0x13f   :  { %870 = vmatpush1.msra.mxu1 %v763_v6 }
 0x140   :  { %871 = vmatprep.subr.mxu1 %v826_v7 }
 0x141   :  { %872 = vmatpush2.msra.mxu1 %v825_v8 }
 0x142   :  { %873 = vmatprep.subr.mxu1 %v824_v9  ;;  %v827_v9 = vld [vmem:[%s1342_s8] sm:$0x3] }
 0x143   :  { %874 = vmatpush2.msra.mxu1 %v823_v10  ;;  %v832_v10 = vrot.slane %v827_v9, %v1300_v15 }
 0x144   :  { %875 = vmatprep.subr.mxu1 %v822_v11  ;;  %v836_v11 = vrot.slane %v827_v9, %v1298_v14 }
 0x145   :  { %876 = vmatpush2.msra.mxu1 %v821_v12 }
 0x146   :  { %877 = vmatprep.subr.mxu1 %v820_v13 }
 0x147   :  { %878 = vmatpush2.msra.mxu1 %v819_v16 }
 0x148   :  { %879 = vmatprep.subr.mxu1 %v818_v17 }
 0x149   :  { %880 = vmatpush2.msra.mxu1 %v817_v18 }
 0x14a   :  { %881 = vmatprep.subr.mxu1 %v816_v19 }
 0x14b   :  { %882 = vmatpush2.msra.mxu1 %v815_v20 }
 0x14c   :  { %883 = vmatprep.subr.mxu1 %v814_v21 }
 0x14d   :  { %884 = vmatpush2.msra.mxu1 %v813_v22 }
 0x14e   :  { %885 = vmatprep.subr.mxu1 %v812_v23 }
 0x14f   :  { %886 = vmatpush2.msra.mxu1 %v811_v24 }
 0x150   :  { %887 = vmatprep.subr.mxu1 %v810_v25 }
 0x151   :  { %888 = vmatpush2.msra.mxu1 %v809_v26 }
 0x152   :  { %889 = vmatprep.subr.mxu1 %v808_v27 }
 0x153   :  { %890 = vmatpush2.msra.mxu1 %v807_v28 }
 0x154   :  { %891 = vmatprep.subr.mxu1 %v806_v29 }
 0x155   :  { %892 = vmatpush2.msra.mxu1 %v805_v30 }
 0x156   :  { %893 = vmatprep.subr.mxu1 %v804_v31 }
 0x157   :  { %894 = vmatpush2.msra.mxu1 %v803_v32 }
 0x158   :  { %895 = vmatprep.subr.mxu1 %v802_v50 }
 0x159   :  { %896 = vmatpush2.msra.mxu1 %v801_v51 }
 0x15a   :  { %897 = vmatprep.subr.mxu1 %v800_v52 }
 0x15b   :  { %898 = vmatpush2.msra.mxu1 %v799_v53 }
 0x15c   :  { %899 = vmatprep.subr.mxu1 %v798_v54 }
 0x15d   :  { %900 = vmatpush2.msra.mxu1 %v797_v55 }
 0x15e   :  { %901 = vmatprep.subr.mxu1 %v796_v56 }
 0x15f   :  { %902 = vmatpush2.msra.mxu1 %v795_v57 }
 0x1e0   :  { %v491_v34 = vpop.f32.mrf.mxu1 }
 0x1e1   :  { %v492_v41 = vadd.f32 %v491_v34, %v290_v36 }
 0x1e2   :  { %v493_v37 = vpop.f32.mrf.mxu1 }
 0x1e3   :  { %v494_v39 = vadd.f32 %v493_v37, %v294_v35  ;;  %v500_v47 = vmax.f32 %v492_v41, 0.0 }
 0x1e4   :  { %v495_v38 = vpop.f32.mrf.mxu1 }
 0x1e5   :  { %v496_v40 = vadd.f32 %v495_v38, %v290_v36  ;;  %v501_v45 = vmax.f32 %v494_v39, 0.0 }
 0x1e6   :  { %v497_v42 = vpop.f32.mrf.mxu1 }
 0x1e7   :  { %v498_v43 = vadd.f32 %v497_v42, %v294_v35  ;;  %v502_v44 = vmax.f32 %v496_v40, 0.0 }
 0x1e9   :  { %v503_v46 = vmax.f32 %v498_v43, 0.0  ;;  %v504_v49 = vpack.c.bf16 %v502_v44, %v500_v47 }
 0x1eb   :  { %v505_v48 = vpack.c.bf16 %v503_v46, %v501_v45 }
 0x1ed   :  { %742 = vmatprep.mubr.bf16.mxu0 %v505_v48 }
 0x1ee   :  { %743 = vmatmul.mubr.bf16.vlgmr.msra.gmra.mxu0 %v504_v49 }
 0x2ae   :  { %v744_v61 = vpop.f32.mrf.mxu0 }
 0x2af   :  { %v745_v62 = vadd.f32 %v744_v61, %v543_v59 }
 0x2b0   :  { %v746_v63 = vpop.f32.mrf.mxu0 }
 0x2b1   :  { %v747_v0 = vadd.f32 %v746_v63, %v547_v60  ;;  %v753_v3 = vmax.f32 %v745_v62, 0.0 }
 0x2b2   :  { %v748_v1 = vpop.f32.mrf.mxu0 }
 0x2b3   :  { %v754_v2 = vmax.f32 %v747_v0, 0.0  ;;  %v749_v4 = vadd.f32 %v748_v1, %v543_v59 }
 0x2b4   :  { %v750_v5 = vpop.f32.mrf.mxu0 }
 0x2b5   :  { %v751_v6 = vadd.f32 %v750_v5, %v547_v60  ;;  %903 = vmatprep.mubr.f32.mxu1 %v754_v2  ;;  %v755_v8 = vmax.f32 %v749_v4, 0.0 }
 0x2b6   :  { %904 = vmatmul.mubr.f32.vlgmr.msra.gmra.mxu1 %v753_v3 }
 0x2b7   :  { %v756_v7 = vmax.f32 %v751_v6, 0.0 }
 0x2b9   :  { %909 = vmatprep.mubr.f32.mxu1 %v756_v7 }
 0x2ba   :  { %910 = vmatmul.mubr.f32.gmra.mxu1 %v755_v8 }
 0x376   :  { %v905_v12 = vpop.f32.mrf.mxu1 }
 0x377   :  { %v906_v13 = vadd.f32 %v905_v12, %v832_v10 }
 0x378   :  { %v907_v16 = vpop.f32.mrf.mxu1 }
 0x379   :  { %916 = vst [vmem:[%s1343_s9] sm:$0xff] %v906_v13  ;;  %v908_v17 = vadd.f32 %v907_v16, %v836_v11 }
 0x37a   :  { %v911_v18 = vpop.f32.mrf.mxu1 }
 0x37b   :  { %917 = vst [vmem:[%s1343_s9 + $0x8] sm:$0xff] %v908_v17  ;;  %v912_v19 = vadd.f32 %v911_v18, %v832_v10 }
 0x37c   :  { %v913_v20 = vpop.f32.mrf.mxu1 }
 0x37d   :  { %918 = vst [vmem:[%s1343_s9 + $0x10] sm:$0xff] %v912_v19  ;;  %v914_v14 = vadd.f32 %v913_v20, %v836_v11 }
 0x37f   :  { %919 = vst [vmem:[%s1343_s9 + $0x18] sm:$0xff] %v914_v14 }
 0x380   :  { %924 = vsyncpa [#allocation3], 1 }
 0x381   :  { %925 = vsyncpa [#allocation5], 1 }
 0x382   :  { %926 = vsyncpa [#allocation8], 1 }

</bundles_post_ra>
